<compile_context>
chip_gen: v7x
topology: tpu7x:2x2x1
jax: 0.10.0
libtpu: 0.0.40
codegen_flags: <defaults>
</compile_context>

<pallas_src>
import jax
import jax.numpy as jnp
from jax.experimental import pallas as pl
from jax.experimental.pallas import tpu as pltpu


def _reward_criterion_wc_kernel(inp_ref, seq_ref, rew_ref,
                                num_ref, den_ref,
                                num_acc, den_acc):
    j = pl.program_id(1)
    nt = pl.num_programs(1)
    tb = inp_ref.shape[0]          # static batch-tile size

    @pl.when(j == 0)
    def _init():
        num_acc[...] = jnp.zeros_like(num_acc)
        den_acc[...] = jnp.zeros_like(den_acc)

    # Per-tile casts in VMEM (inputs stay in their native dtypes in HBM).
    inp = inp_ref[...].astype(jnp.float32)            # (TB, TT)
    rew = rew_ref[...].astype(jnp.float32)            # (TB|1, TT|1) -> broadcasts
    present = (seq_ref[...] > 0).astype(jnp.float32)  # (TB, TT)

    # Lane-dense partials: collapse only the sublane (batch) axis per step;
    # the cross-lane reduction is deferred to the finalize below.
    # NOTE: the numerator intentionally does NOT apply the shifted mask --
    # this matches the PyTorch module, which only uses mask.sum().
    num_acc[...] += jnp.sum(-jnp.exp(inp) * rew, axis=0, keepdims=True)  # (1, TT)
    den_acc[...] += jnp.sum(present, axis=0, keepdims=True)              # (1, TT)

    @pl.when(j == nt - 1)
    def _finalize():
        # mask = cat([ones(B,1), (seq>0)[:, :-1]]):
        #   sum(mask) per batch tile = TB + sum(seq>0) - sum(seq[:, T-1] > 0)
        # `present` here is the LAST T-tile, so its final column is the global
        # last column (requires exact-division tiling, which we enforce).
        last_col = jnp.sum(present[:, -1:])
        num_ref[...] = jnp.sum(num_acc[...]).reshape(1, 1)
        den_ref[...] = (jnp.sum(den_acc[...]) - last_col + tb).reshape(1, 1)


def _elem_budget():
    """Per-input tile element budget, generation-aware."""
    try:
        kind = jax.devices()[0].device_kind.lower()
    except Exception:
        kind = ""
    if "v5" in kind:
        return 512 * 1024   # v5e: 2 MiB f32 tiles already amortize the step cost
    return 1024 * 1024      # v6e / v7x: larger tiles cut per-step overhead


def _pick_tt(T, budget):
    cands = (2048, 1024, 512, 256, 128) if budget >= 1024 * 1024 else (1024, 512, 256, 128)
    for c in cands:
        if c <= T and T % c == 0:
            return c
    return T


def _pick_tb(B, tt, budget):
    max_tb = max(8, budget // max(tt, 1))
    # Prefer nb >= 2 so the "parallel" batch axis feeds both v7x TensorCores.
    cap = min(max_tb, B // 2) if B >= 16 else max_tb
    for c in (1024, 512, 256, 128, 64, 32, 16, 8):
        if c <= cap and B % c == 0:
            return c
    # Fall back: any multiple-of-8 divisor within the VMEM budget.
    for c in (1024, 512, 256, 128, 64, 32, 16, 8):
        if c <= max_tb and B % c == 0:
            return c
    return B


def _normalize_reward(reward, B, T):
    """Return reward as a 2-D array broadcastable against (B, T)."""
    reward = jnp.asarray(reward)
    if reward.ndim == 0:
        return reward.reshape(1, 1)
    if reward.ndim == 1:
        n = reward.shape[0]
        # PyTorch broadcasting: a length-T vector broadcasts along the last dim.
        # (If B == T this is ambiguous; we follow PyTorch semantics.)
        if n == T:
            return reward.reshape(1, T)
        if n == B * T:
            return reward.reshape(B, T)
        if n == B:
            return reward.reshape(B, 1)   # per-sequence convenience
        raise ValueError(f"1-D reward of length {n} incompatible with (B,T)=({B},{T})")
    if reward.ndim == 2:
        rB, rT = reward.shape
        if rB in (1, B) and rT in (1, T):
            return reward
    raise ValueError(f"reward shape {reward.shape} incompatible with (B,T)=({B},{T})")


def reward_criterion_wc(inp, seq, sam_logprobs, reward):
    """Pallas implementation of RewardCriterion_WC.forward.

    inp:          (B, T) float (f32 or bf16)  -- `input` in the PyTorch module
    seq:          (B, T) int   (i32/i16/i8)   -- token ids (0 == padding)
    sam_logprobs: unused (kept for signature parity)
    reward:       broadcastable against (B, T)
    returns: scalar float32
    """
    del sam_logprobs  # not used by the forward pass
    B, T = inp.shape
    assert seq.shape == (B, T)

    reward = _normalize_reward(reward, B, T)
    rB, rT = reward.shape

    budget = _elem_budget()
    tt = _pick_tt(T, budget)
    tb = _pick_tb(B, tt, budget)
    nb, nt = B // tb, T // tt

    # Reward streamed in its native (possibly unbroadcast) shape.
    rew_tb = tb if rB == B else 1
    rew_tt = tt if rT == T else 1
    rew_spec = pl.BlockSpec(
        (rew_tb, rew_tt),
        lambda i, j: (i if rB == B else 0, j if rT == T else 0))

    # VMEM budget derived from the actual tile math (2 buffers per stream).
    n_buf = 2
    stream_bytes = (tb * tt * jnp.dtype(inp.dtype).itemsize
                    + tb * tt * jnp.dtype(seq.dtype).itemsize
                    + rew_tb * rew_tt * jnp.dtype(reward.dtype).itemsize)
    scratch_bytes = 2 * 8 * tt * 4          # two (1, tt) f32 scratches (sublane-padded)
    out_bytes = 2 * n_buf * 8 * 128 * 4     # two tiny (1,1) output blocks, padded
    vmem_limit = n_buf * stream_bytes + scratch_bytes + out_bytes + (4 << 20)
    vmem_limit = int(min(max(vmem_limit, 8 << 20), 48 << 20))

    num_parts, den_parts = pl.pallas_call(
        _reward_criterion_wc_kernel,
        out_shape=(jax.ShapeDtypeStruct((nb, 1), jnp.float32),
                   jax.ShapeDtypeStruct((nb, 1), jnp.float32)),
        grid_spec=pltpu.PrefetchScalarGridSpec(
            num_scalar_prefetch=0,
            grid=(nb, nt),
            in_specs=[
                pl.BlockSpec((tb, tt), lambda i, j: (i, j)),   # input
                pl.BlockSpec((tb, tt), lambda i, j: (i, j)),   # seq
                rew_spec,                                      # reward
            ],
            out_specs=[
                pl.BlockSpec((1, 1), lambda i, j: (i, 0)),     # num partial / batch tile
                pl.BlockSpec((1, 1), lambda i, j: (i, 0)),     # den partial / batch tile
            ],
            scratch_shapes=[pltpu.VMEM((1, tt), jnp.float32),
                            pltpu.VMEM((1, tt), jnp.float32)],
        ),
        compiler_params=pltpu.CompilerParams(
            dimension_semantics=("parallel", "arbitrary"),
            vmem_limit_bytes=vmem_limit,
        ),
    )(inp, seq, reward)

    # Tiny final reduction + divide in XLA (keeps the batch-tile axis free to
    # run on both TensorCores on v7x).
    return jnp.sum(num_parts) / jnp.sum(den_parts)


def _reference(inp, seq, sam_logprobs, reward):
    # Pure-JAX reference mirroring the PyTorch code exactly.
    del sam_logprobs
    B = seq.shape[0]
    mask = (seq > 0).astype(jnp.float32)
    mask = jnp.concatenate([jnp.ones((B, 1), jnp.float32), mask[:, :-1]], axis=1)
    mask = mask.reshape(-1)
    output = -jnp.exp(inp.astype(jnp.float32)) * jnp.asarray(reward, jnp.float32)
    output = jnp.sum(output.reshape(output.shape[0], -1), axis=1)
    return jnp.sum(output) / jnp.sum(mask)


if __name__ == "__main__":
    key = jax.random.PRNGKey(0)
    B, T = 2, 8
    k1, k2, k3, k4 = jax.random.split(key, 4)

    # `input` are (log-)probabilities -> keep them negative-ish
    inp = -jax.random.uniform(k1, (B, T), jnp.float32, minval=0.1, maxval=3.0)
    # `seq`: token ids with some zeros (padding)
    seq = jax.random.randint(k2, (B, T), minval=0, maxval=5).astype(jnp.int32)
    # sam_logprobs: unused by the forward pass
    sam_logprobs = jax.random.normal(k3, (B, T), jnp.float32)

    # Case 1: per-token reward (B, T)
    reward_bt = jax.random.normal(k4, (B, T), jnp.float32)
    out_bt = jax.block_until_ready(
        reward_criterion_wc(inp, seq, sam_logprobs, reward_bt))
    ref_bt = _reference(inp, seq, sam_logprobs, reward_bt)
    assert jnp.allclose(out_bt, ref_bt, rtol=1e-5, atol=1e-5), (out_bt, ref_bt)

    # Case 2: per-sequence reward (B, 1), streamed unbroadcast.
    reward_b1 = jax.random.normal(k4, (B, 1), jnp.float32)
    out_b1 = jax.block_until_ready(
        reward_criterion_wc(inp, seq, sam_logprobs, reward_b1))
    ref_b1 = _reference(inp, seq, sam_logprobs, reward_b1)
    assert jnp.allclose(out_b1, ref_b1, rtol=1e-5, atol=1e-5), (out_b1, ref_b1)

    # Case 3: scalar reward
    reward_sc = jnp.float32(0.75)
    out_sc = jax.block_until_ready(
        reward_criterion_wc(inp, seq, sam_logprobs, reward_sc))
    ref_sc = _reference(inp, seq, sam_logprobs, reward_sc)
    assert jnp.allclose(out_sc, ref_sc, rtol=1e-5, atol=1e-5), (out_sc, ref_sc)

    print("KERNEL_OK")
</pallas_src>

<mosaic_0001>
module attributes {stable_mosaic.version = 11 : i64} {
  func.func @_reward_criterion_wc_kernel(%arg0: i32, %arg1: i32, %arg2: memref<2x8xf32, #tpu.memory_space<vmem>>, %arg3: memref<2x8xi32, #tpu.memory_space<vmem>>, %arg4: memref<2x8xf32, #tpu.memory_space<vmem>>, %arg5: memref<1x1xf32, #tpu.memory_space<vmem>>, %arg6: memref<1x1xf32, #tpu.memory_space<vmem>>, %arg7: memref<1x8xf32, #tpu.memory_space<vmem>>, %arg8: memref<1x8xf32, #tpu.memory_space<vmem>>) attributes {dimension_semantics = [#tpu.dimension_semantics<parallel>, #tpu.dimension_semantics<arbitrary>], iteration_bounds = array<i64: 1, 1>, scalar_prefetch = 0 : i64, scratch_operands = 2 : i64, tpu.core_type = #tpu.core_type<tc>, window_params = [{transform_indices = @transform_0, window_bounds = array<i64: 2, 8>}, {transform_indices = @transform_1, window_bounds = array<i64: 2, 8>}, {transform_indices = @transform_2, window_bounds = array<i64: 2, 8>}, {transform_indices = @transform_3, window_bounds = array<i64: 1, 1>}, {transform_indices = @transform_4, window_bounds = array<i64: 1, 1>}]} {
    %c0_i32 = arith.constant 0 : i32
    %0 = arith.cmpi eq, %arg1, %c0_i32 : i32
    %1 = arith.extui %0 : i1 to i32
    %c0_i32_0 = arith.constant 0 : i32
    %2 = arith.cmpi ne, %1, %c0_i32_0 : i32
    scf.if %2 {
      %cst_19 = arith.constant 0.000000e+00 : f32
      %27 = vector.broadcast %cst_19 : f32 to vector<1x8xf32>
      %c0_20 = arith.constant 0 : index
      %c0_21 = arith.constant 0 : index
      %28 = vector.load %arg7[%c0_20, %c0_21] : memref<1x8xf32, #tpu.memory_space<vmem>>, vector<1x8xf32>
      tpu.vector_store %arg7[%c0_20, %c0_21], %27 {strides = array<i32>} : memref<1x8xf32, #tpu.memory_space<vmem>>, vector<1x8xf32>,
      %cst_22 = arith.constant 0.000000e+00 : f32
      %29 = vector.broadcast %cst_22 : f32 to vector<1x8xf32>
      %c0_23 = arith.constant 0 : index
      %c0_24 = arith.constant 0 : index
      %30 = vector.load %arg8[%c0_23, %c0_24] : memref<1x8xf32, #tpu.memory_space<vmem>>, vector<1x8xf32>
      tpu.vector_store %arg8[%c0_23, %c0_24], %29 {strides = array<i32>} : memref<1x8xf32, #tpu.memory_space<vmem>>, vector<1x8xf32>,
    } else {
    }
    %c0 = arith.constant 0 : index
    %c0_1 = arith.constant 0 : index
    %3 = vector.load %arg2[%c0, %c0_1] : memref<2x8xf32, #tpu.memory_space<vmem>>, vector<2x8xf32>
    %c0_2 = arith.constant 0 : index
    %c0_3 = arith.constant 0 : index
    %4 = vector.load %arg4[%c0_2, %c0_3] : memref<2x8xf32, #tpu.memory_space<vmem>>, vector<2x8xf32>
    %c0_4 = arith.constant 0 : index
    %c0_5 = arith.constant 0 : index
    %5 = vector.load %arg3[%c0_4, %c0_5] : memref<2x8xi32, #tpu.memory_space<vmem>>, vector<2x8xi32>
    %c0_i32_6 = arith.constant 0 : i32
    %6 = vector.broadcast %c0_i32_6 : i32 to vector<2x8xi32>
    %7 = arith.cmpi sgt, %5, %6 : vector<2x8xi32>
    %8 = arith.extui %7 : vector<2x8xi1> to vector<2x8xi32>
    %9 = arith.sitofp %8 : vector<2x8xi32> to vector<2x8xf32>
    %c0_7 = arith.constant 0 : index
    %c0_8 = arith.constant 0 : index
    %10 = vector.load %arg7[%c0_7, %c0_8] : memref<1x8xf32, #tpu.memory_space<vmem>>, vector<1x8xf32>
    %11 = math.exp %3 : vector<2x8xf32>
    %cst = arith.constant 0.000000e+00 : f32
    %12 = vector.broadcast %cst : f32 to vector<2x8xf32>
    %13 = arith.subf %12, %11 : vector<2x8xf32>
    %14 = arith.mulf %13, %4 : vector<2x8xf32>
    %cst_9 = arith.constant dense<0.000000e+00> : vector<8xf32>
    %15 = vector.multi_reduction <add>, %14, %cst_9 [0] : vector<2x8xf32> to vector<8xf32>
    %16 = vector.shape_cast %15 : vector<8xf32> to vector<1x8xf32>
    %17 = arith.addf %10, %16 : vector<1x8xf32>
    %c0_10 = arith.constant 0 : index
    %c0_11 = arith.constant 0 : index
    %18 = vector.load %arg7[%c0_10, %c0_11] : memref<1x8xf32, #tpu.memory_space<vmem>>, vector<1x8xf32>
    tpu.vector_store %arg7[%c0_10, %c0_11], %17 {strides = array<i32>} : memref<1x8xf32, #tpu.memory_space<vmem>>, vector<1x8xf32>,
    %c0_12 = arith.constant 0 : index
    %c0_13 = arith.constant 0 : index
    %19 = vector.load %arg8[%c0_12, %c0_13] : memref<1x8xf32, #tpu.memory_space<vmem>>, vector<1x8xf32>
    %cst_14 = arith.constant dense<0.000000e+00> : vector<8xf32>
    %20 = vector.multi_reduction <add>, %9, %cst_14 [0] : vector<2x8xf32> to vector<8xf32>
    %21 = vector.shape_cast %20 : vector<8xf32> to vector<1x8xf32>
    %22 = arith.addf %19, %21 : vector<1x8xf32>
    %c0_15 = arith.constant 0 : index
    %c0_16 = arith.constant 0 : index
    %23 = vector.load %arg8[%c0_15, %c0_16] : memref<1x8xf32, #tpu.memory_space<vmem>>, vector<1x8xf32>
    tpu.vector_store %arg8[%c0_15, %c0_16], %22 {strides = array<i32>} : memref<1x8xf32, #tpu.memory_space<vmem>>, vector<1x8xf32>,
    %c0_i32_17 = arith.constant 0 : i32
    %24 = arith.cmpi eq, %arg1, %c0_i32_17 : i32
    %25 = arith.extui %24 : i1 to i32
    %c0_i32_18 = arith.constant 0 : i32
    %26 = arith.cmpi ne, %25, %c0_i32_18 : i32
    scf.if %26 {
      %27 = vector.extract_strided_slice %9 {offsets = [0, 7], sizes = [2, 1], strides = [1, 1]} : vector<2x8xf32> to vector<2x1xf32>
      %28 = vector.shape_cast %27 : vector<2x1xf32> to vector<1x2x1xf32>
      %cst_19 = arith.constant dense<0.000000e+00> : vector<1xf32>
      %29 = vector.multi_reduction <add>, %28, %cst_19 [1, 2] : vector<1x2x1xf32> to vector<1xf32>
      %30 = vector.shape_cast %29 : vector<1xf32> to vector<1x1x1xf32>
      %31 = vector.extract %30[0, 0, 0] : f32 from vector<1x1x1xf32>
      %c0_20 = arith.constant 0 : index
      %c0_21 = arith.constant 0 : index
      %32 = vector.load %arg7[%c0_20, %c0_21] : memref<1x8xf32, #tpu.memory_space<vmem>>, vector<1x8xf32>
      %33 = vector.shape_cast %32 : vector<1x8xf32> to vector<1x1x8xf32>
      %cst_22 = arith.constant dense<0.000000e+00> : vector<1xf32>
      %34 = vector.multi_reduction <add>, %33, %cst_22 [1, 2] : vector<1x1x8xf32> to vector<1xf32>
      %35 = vector.shape_cast %34 : vector<1xf32> to vector<1x1x1xf32>
      %36 = vector.extract %35[0, 0, 0] : f32 from vector<1x1x1xf32>
      %37 = vector.broadcast %36 : f32 to vector<1x1xf32>
      %c0_23 = arith.constant 0 : index
      %c0_24 = arith.constant 0 : index
      %38 = vector.load %arg5[%c0_23, %c0_24] : memref<1x1xf32, #tpu.memory_space<vmem>>, vector<1x1xf32>
      tpu.vector_store %arg5[%c0_23, %c0_24], %37 {strides = array<i32>} : memref<1x1xf32, #tpu.memory_space<vmem>>, vector<1x1xf32>,
      %c0_25 = arith.constant 0 : index
      %c0_26 = arith.constant 0 : index
      %39 = vector.load %arg8[%c0_25, %c0_26] : memref<1x8xf32, #tpu.memory_space<vmem>>, vector<1x8xf32>
      %40 = vector.shape_cast %39 : vector<1x8xf32> to vector<1x1x8xf32>
      %cst_27 = arith.constant dense<0.000000e+00> : vector<1xf32>
      %41 = vector.multi_reduction <add>, %40, %cst_27 [1, 2] : vector<1x1x8xf32> to vector<1xf32>
      %42 = vector.shape_cast %41 : vector<1xf32> to vector<1x1x1xf32>
      %43 = vector.extract %42[0, 0, 0] : f32 from vector<1x1x1xf32>
      %44 = arith.subf %43, %31 : f32
      %cst_28 = arith.constant 2.000000e+00 : f32
      %45 = arith.addf %44, %cst_28 : f32
      %46 = vector.broadcast %45 : f32 to vector<1x1xf32>
      %c0_29 = arith.constant 0 : index
      %c0_30 = arith.constant 0 : index
      %47 = vector.load %arg6[%c0_29, %c0_30] : memref<1x1xf32, #tpu.memory_space<vmem>>, vector<1x1xf32>
      tpu.vector_store %arg6[%c0_29, %c0_30], %46 {strides = array<i32>} : memref<1x1xf32, #tpu.memory_space<vmem>>, vector<1x1xf32>,
    } else {
    }
    return
  }
  func.func @transform_0(%arg0: i32, %arg1: i32) -> (i32, i32) {
    %c0_i32 = arith.constant 0 : i32
    return %arg0, %arg1 : i32, i32
  }
  func.func @transform_1(%arg0: i32, %arg1: i32) -> (i32, i32) {
    %c0_i32 = arith.constant 0 : i32
    return %arg0, %arg1 : i32, i32
  }
  func.func @transform_2(%arg0: i32, %arg1: i32) -> (i32, i32) {
    %c0_i32 = arith.constant 0 : i32
    return %arg0, %arg1 : i32, i32
  }
  func.func @transform_3(%arg0: i32, %arg1: i32) -> (i32, i32) {
    %c0_i32 = arith.constant 0 : i32
    %c0_i32_0 = arith.constant 0 : i32
    return %arg0, %c0_i32 : i32, i32
  }
  func.func @transform_4(%arg0: i32, %arg1: i32) -> (i32, i32) {
    %c0_i32 = arith.constant 0 : i32
    %c0_i32_0 = arith.constant 0 : i32
    return %arg0, %c0_i32 : i32, i32
  }
}

</mosaic_0001>

<bundles_post_ra>
// kernel: tpu_custom_call.1
= control target key start
LH: loop header
LB: loop body
LE: loop exit
PB: predicated region body
PF: predicated region fallthrough
CT: control target
= control target key end

     0   :  { %10 = vsyncpa [#allocation5], 0  ;;  %s313_s0 = inlined_call_operand.hbm [shape: f32[2,8], index: 0, kind: input, shape index: {}]   ;;  %s314_s1 = inlined_call_operand.vmem [shape: s32[2,8], index: 1, kind: input, shape index: {}]   ;;  %s315_s2 = inlined_call_operand.vmem [shape: f32[2,8], index: 2, kind: input, shape index: {}]   ;;  %s316_s3 = inlined_call_operand.hbm [shape: f32[1,1], index: 3, kind: output, shape index: {0}]   ;;  %s317_s4 = inlined_call_operand.hbm [shape: f32[1,1], index: 4, kind: output, shape index: {1}]  }
   0x1   :  { %11 = vsyncpa [#allocation6], 0 }
   0x2   :  { %12 = vsyncpa [#allocation9], 0  ;;  %s231_s15 = smov [#allocation4]   ;;  %s159_s19 = scalar_lea.hbm %s313_s0, 32 }
   0x3   :  { %s19_s16 = sshll.u32 %s231_s15, 4  ;;  %p160_p0 = scmp.ne.s32.totalorder %s313_s0, %s159_s19  ;;  %s20_s16 = int_to_ptr.vmem [resolvable:$true] %s19_s16 }
   0x4   :  { %p163_p1 = scmp.lt.u32.totalorder %s159_s19, %s313_s0 }
   0x6   :  { %p165_p2 = pnand %p163_p1, %p160_p0 }
   0x8   :  { %168 = shalt.err (!%p165_p2)
}
   0x9   :  { %s169_s24 = scalar_lea.vmem %s20_s16, 32  ;;  %p174_p4 = scmp.lt.s32.totalorder %s20_s16, %s20_s16 }
   0xa   :  { %p170_p3 = scmp.ne.s32.totalorder %s20_s16, %s169_s24  ;;  %p175_p5 = scmp.lt.s32.totalorder %s169_s24, %s169_s24 }
   0xc   :  { %p176_p6 = por %p175_p5, %p174_p4 }
   0xe   :  { %p177_p7 = pnand %p176_p6, %p170_p3 }
  0x10   :  { %180 = shalt.err (!%p177_p7)
}
  0x11   :  { %22 = dma.hbm_to_vmem [thread:$0]  %s313_s0, 32, %s20_s16, [#allocation5]  }
  0x12   :  { %225 = dma.done.wait [#allocation5], 32  }
  0x13   :  { %226 = vsyncadd [#allocation5], 4294967264  ;;  %vm34_vm0 = vcmask 57344   ;;  %v232_v0 = vmov 0.0   ;;  %v39_v1 = vld [vmem:[%s314_s1] sm:$0x3] }
  0x14   :  { %35 = vst.msk [vmem:[#allocation2] sm:$0x1] %vm34_vm0, %v232_v0  ;;  %36 = vst.msk [vmem:[#allocation3] sm:$0x1] %vm34_vm0, %v232_v0  ;;  %v37_v2 = vld [vmem:[#allocation4] sm:$0x3] }
  0x15   :  { %vm40_vm1 = vcmp.gt.s32.totalorder %v39_v1, 0  ;;  %v44_v3 = vmul.f32 1.442695, %v37_v2  ;;  %vm48_vm2 = vcmask 58368   ;;  %s233_s29 = smov 121   ;;  %vm76_vm3 = vcmask 1024  }
  0x16   :  { %v145_v4 = vsel %vm40_vm1, 1.0, %v232_v0  ;;  %v38_v12 = vld [vmem:[%s315_s2] sm:$0x3]  ;;  %s234_s1 = smov [#allocation7]   ;;  %vm99_vm4 = vcmask 0   ;;  %s235_s9 = smov [#allocation8]  }
  0x17   :  { %73 = vrot.lane.b32.xlu0 %v145_v4, %s233_s29  ;;  %157 = vpow2.f32 %v44_v3  ;;  %v60_v5 = vsel %vm48_vm2, %v145_v4, 0.0  ;;  %s122_s2 = sshll.u32 %s234_s1, 4  ;;  %s132_s10 = sshll.u32 %s235_s9, 4  ;;  %s123_s2 = int_to_ptr.vmem [resolvable:$true] %s122_s2  ;;  %s133_s10 = int_to_ptr.vmem [resolvable:$true] %s132_s10 }
  0x18   :  { %v61_v6 = vrot.slane %v60_v5, 4  ;;  %s181_s11 = scalar_lea.vmem %s123_s2, 16  ;;  %s185_s12 = scalar_lea.vmem %s123_s2, 32 }
  0x19   :  { %p182_p8 = scmp.ne.s32.totalorder %s123_s2, %s181_s11  ;;  %p186_p9 = scmp.lt.s32.totalorder %s123_s2, %s123_s2 }
  0x1a   :  { %v62_v7 = vadd.f32 %v61_v6, %v60_v5  ;;  %p187_p10 = scmp.lt.s32.totalorder %s185_s12, %s181_s11 }
  0x1b   :  { %v59_v13 = vld [vmem:[#allocation3] sm:$0x1]  ;;  %v43_v24 = vld [vmem:[#allocation2] sm:$0x1] }
  0x1c   :  { %v63_v8 = vrot.slane %v62_v7, 2  ;;  %p188_p11 = por %p187_p10, %p186_p9 }
  0x1e   :  { %v64_v9 = vadd.f32 %v63_v8, %v62_v7  ;;  %p189_p12 = pnand %p188_p11, %p182_p8 }
  0x20   :  { %v65_v10 = vrot.slane %v64_v9, 1 }
  0x21   :  { %v158_v11 = vpop.eup %157 }
  0x22   :  { %v46_v14 = vsub.f32 0.0, %v158_v11  ;;  %v66_v15 = vadd.f32 %v65_v10, %v64_v9 }
  0x24   :  { %v47_v16 = vmul.f32 %v46_v14, %v38_v12  ;;  %v67_v17 = vadd.f32 %v66_v15, %v59_v13 }
  0x26   :  { %v49_v18 = vsel %vm48_vm2, %v47_v16, 0.0  ;;  %68 = vst.msk [vmem:[#allocation3] sm:$0x1] %vm34_vm0, %v67_v17 }
  0x27   :  { %v50_v19 = vrot.slane %v49_v18, 4 }
  0x29   :  { %v51_v20 = vadd.f32 %v50_v19, %v49_v18 }
  0x2b   :  { %v52_v21 = vrot.slane %v51_v20, 2 }
  0x2d   :  { %v53_v22 = vadd.f32 %v52_v21, %v51_v20  ;;  %v101_v28 = vld [vmem:[#allocation3] sm:$0x1] }
  0x2e   :  { %v102_v30 = vsel %vm34_vm0, %v101_v28, 0.0 }
  0x2f   :  { %v54_v23 = vrot.slane %v53_v22, 1 }
  0x31   :  { %v55_v25 = vadd.f32 %v54_v23, %v53_v22 }
  0x33   :  { %v56_v26 = vadd.f32 %v55_v25, %v43_v24 }
  0x35   :  { %58 = vst.msk [vmem:[#allocation2] sm:$0x1] %vm34_vm0, %v56_v26 }
  0x3c   :  { %v87_v27 = vld [vmem:[#allocation2] sm:$0x1] }
  0x3d   :  { %v88_v29 = vsel %vm34_vm0, %v87_v27, 0.0 }
  0x3e   :  { %89 = vadd.xlane.f32.xlu1 %v88_v29 }
  0x42   :  { %103 = vadd.xlane.f32.xlu1 %v102_v30 }
  0x89   :  { %v74_v31 = vpop.permute.xlu0 %73 }
  0x8a   :  { %v77_v32 = vsel %vm76_vm3, %v74_v31, 0.0 }
  0x8b   :  { %78 = vadd.xlane.f32.xlu0 %v77_v32 }
  0xcb   :  { %v90_v33 = vpop.xlane.xlu1 %89 }
  0xcc   :  { %v91_v35 = vrot.slane %v90_v33, 4 }
  0xce   :  { %v92_v37 = vadd.f32 %v91_v35, %v90_v33 }
  0xcf   :  { %v104_v34 = vpop.xlane.xlu1 %103 }
  0xd0   :  { %v105_v36 = vrot.slane %v104_v34, 4  ;;  %v93_v39 = vrot.slane %v92_v37, 2 }
  0xd2   :  { %v106_v38 = vadd.f32 %v105_v36, %v104_v34  ;;  %v94_v44 = vadd.f32 %v93_v39, %v92_v37 }
  0xd4   :  { %v107_v41 = vrot.slane %v106_v38, 2  ;;  %v95_v48 = vrot.slane %v94_v44, 1 }
  0xd6   :  { %v108_v45 = vadd.f32 %v107_v41, %v106_v38  ;;  %v96_v52 = vadd.f32 %v95_v48, %v94_v44 }
  0xd8   :  { %v109_v50 = vrot.slane %v108_v45, 1 }
  0xda   :  { %v110_v53 = vadd.f32 %v109_v50, %v108_v45 }
 0x118   :  { %v79_v40 = vpop.xlane.xlu0 %78 }
 0x119   :  { %v80_v42 = vrot.slane %v79_v40, 4 }
 0x11b   :  { %v81_v43 = vadd.f32 %v80_v42, %v79_v40 }
 0x11d   :  { %v82_v46 = vrot.slane %v81_v43, 2 }
 0x11f   :  { %v83_v47 = vadd.f32 %v82_v46, %v81_v43 }
 0x121   :  { %v84_v49 = vrot.slane %v83_v47, 1 }
 0x123   :  { %v85_v51 = vadd.f32 %v84_v49, %v83_v47 }
 0x125   :  { %146 = vpush %v85_v51 }
 0x126   :  { %148 = vpush %v96_v52 }
 0x127   :  { %150 = vpush %v110_v53 }
 0x156   :  { %s147_s5 = spop %146 }
 0x157   :  { %s149_s6 = spop %148 }
 0x158   :  { %v98_v54 = vstv %s149_s6  ;;  %s151_s7 = spop %150 }
 0x159   :  { %s112_s8 = ssub.f32 %s151_s7, %s147_s5  ;;  %100 = vst.msk [vmem:[#allocation7] sm:$0x1] %vm99_vm4, %v98_v54 }
 0x15a   :  { %192 = shalt.err (!%p189_p12)
}
 0x15b   :  { %s193_s15 = scalar_lea.hbm %s316_s3, 16 }
 0x15c   :  { %p194_p13 = scmp.ne.s32.totalorder %s316_s3, %s193_s15  ;;  %p197_p0 = scmp.lt.u32.totalorder %s193_s15, %s316_s3 }
 0x15e   :  { %p199_p1 = pnand %p197_p0, %p194_p13 }
 0x160   :  { %202 = shalt.err (!%p199_p1)
}
 0x161   :  { %125 = dma.vmem_to_hbm [thread:$0]  %s123_s2, 16, %s316_s3, [#allocation6]  }
 0x162   :  { %s113_s22 = sadd.f32 2.0, %s112_s8  ;;  %s203_s23 = scalar_lea.vmem %s133_s10, 16 }
 0x163   :  { %p204_p2 = scmp.ne.s32.totalorder %s133_s10, %s203_s23  ;;  %s207_s24 = scalar_lea.vmem %s133_s10, 32 }
 0x164   :  { %v114_v55 = vstv %s113_s22  ;;  %p208_p3 = scmp.lt.s32.totalorder %s133_s10, %s133_s10  ;;  %p209_p4 = scmp.lt.s32.totalorder %s207_s24, %s203_s23 }
 0x165   :  { %115 = vst.msk [vmem:[#allocation8] sm:$0x1] %vm99_vm4, %v114_v55 }
 0x166   :  { %p210_p5 = por %p209_p4, %p208_p3 }
 0x168   :  { %p211_p6 = pnand %p210_p5, %p204_p2 }
 0x16a   :  { %214 = shalt.err (!%p211_p6)
}
 0x16b   :  { %s215_s27 = scalar_lea.hbm %s317_s4, 16 }
 0x16c   :  { %p216_p7 = scmp.ne.s32.totalorder %s317_s4, %s215_s27  ;;  %p219_p8 = scmp.lt.u32.totalorder %s215_s27, %s317_s4 }
 0x16e   :  { %p221_p9 = pnand %p219_p8, %p216_p7 }
 0x170   :  { %224 = shalt.err (!%p221_p9)
}
 0x171   :  { %135 = dma.vmem_to_hbm [thread:$0]  %s133_s10, 16, %s317_s4, [#allocation9]  }
 0x172   :  { %227 = dma.done.wait [#allocation6], 16  }
 0x173   :  { %228 = vsyncadd [#allocation6], 4294967280 }
 0x174   :  { %229 = dma.done.wait [#allocation9], 16  }
 0x175   :  { %230 = vsyncadd [#allocation9], 4294967280 }
 0x176   :  { %142 = vsyncpa [#allocation5], 1 }
 0x177   :  { %143 = vsyncpa [#allocation6], 1 }
 0x178   :  { %144 = vsyncpa [#allocation9], 1 }

</bundles_post_ra>
